<compile_context>
chip_gen: v7x
topology: tpu7x:2x2x1
jax: 0.10.0
libtpu: 0.0.40
codegen_flags: <defaults>
</compile_context>

<pallas_src>
import functools
import math

import jax
import jax.numpy as jnp
import numpy as np
from jax.experimental import pallas as pl
from jax.experimental.pallas import tpu as pltpu

_LANE = 128
_TARGET_BLOCK_BYTES = 1 << 20   # ~1 MiB per array block; x/u/out double-buffered plus
                                # the small pe block stays well under v5e's 16 MiB
                                # scoped-VMEM default (and v6e/v7x's 32 MiB).
_MAX_LANE_TILE = 8192           # lanes per block before we start tiling the lane axis


def build_pe(max_len: int, d_model: int) -> jnp.ndarray:
    """Reproduces the (buggy) PyTorch __init__ pe construction in plain JAX."""
    if d_model != 2:
        # The reference assignments pe[:, 0:2] = ... / pe[:, 1:2] = ... only
        # broadcast correctly when d_model == 2.
        raise ValueError("reference __init__ only runs for d_model == 2")
    position = jnp.arange(max_len, dtype=jnp.float32)[:, None]                  # (L, 1)
    div_term = jnp.exp(jnp.arange(0, d_model, 2, dtype=jnp.float32)
                       * (-math.log(10000.0) / d_model))                        # (1,)
    pe = jnp.zeros((max_len, d_model), jnp.float32)
    # pe[:, 0:2] = sin(position * div_term)   (rhs (L, 1) broadcasts over both cols)
    pe = pe.at[:, 0:2].set(jnp.broadcast_to(jnp.sin(position * div_term),
                                            (max_len, 2)))
    # pe[:, 1:2] = cos(position * div_term)
    pe = pe.at[:, 1:2].set(jnp.cos(position * div_term))
    return pe[:, None, :]                                                       # (L, 1, D)


def _pick_tile(n: int, unit: int, target: int) -> int:
    """Largest multiple of `unit` that divides `n` and is <= target.

    Falls back to the full axis length (block == full array dim is always a legal
    block shape and satisfies the TPU (8, 128) rule)."""
    if n <= target:
        return n
    if unit <= 0 or n % unit:
        return n
    t = (target // unit) * unit
    while t >= unit:
        if n % t == 0:
            return t
        t -= unit
    return n


def _add_dropout_kernel(x_ref, pe_ref, u_ref, o_ref, *, p: float, inv_keep: float):
    # All refs are lane-dense (TB, TL) blocks of the flattened (B, S*D) view.
    y = x_ref[...] + pe_ref[...]
    if p > 0.0:
        # Inverted dropout: keep with probability 1-p, scale kept values by 1/(1-p).
        # Randoms are streamed in, so the whole decision is one f32 compare + select
        # on the VPU (no shift / int->float convert chain in the kernel).
        keep = u_ref[...] >= jnp.float32(p)
        y = jnp.where(keep, y * jnp.float32(inv_keep), jnp.float32(0.0))
    o_ref[...] = y.astype(o_ref.dtype)


def _fused_add_dropout(x, pe_slice, u, p):
    """(x + pe_slice) with inverted dropout as one lane-dense Pallas kernel.

    x, u: (B, S, D); pe_slice: (B, 1, D), broadcast over the sequence axis exactly
    like the reference forward."""
    B, S, D = x.shape
    F = S * D
    itemsize = jnp.dtype(x.dtype).itemsize

    # Lane-dense view: last dim = S*D (full feature width), not D.
    x2 = x.reshape(B, F)
    u2 = u.reshape(B, F)

    # Tile selection: lane tiles are multiples of lcm(D, 128) so the pe pattern
    # period stays aligned and stores are full-lane; row tiles are multiples of 8
    # sublanes. Full-axis fallbacks are always legal.
    lane_unit = (_LANE * D) // math.gcd(_LANE, D)            # lcm(D, 128)
    TL = _pick_tile(F, lane_unit, _MAX_LANE_TILE)
    TB = _pick_tile(B, 8, max(8, _TARGET_BLOCK_BYTES // (TL * itemsize)))

    # pe pattern pre-tiled in the wrapper to exactly one lane-block width: the
    # flattened pe values repeat with period D along the lane axis, so block (i, 0)
    # is correct for every lane block j, and the pipeline keeps it resident across
    # the inner lane axis instead of re-DMAing 8 bytes per grid step.
    pe_pattern = jnp.tile(pe_slice[:, 0, :], (1, TL // D))   # (B, TL)

    kernel = functools.partial(
        _add_dropout_kernel, p=float(p),
        inv_keep=(1.0 / (1.0 - p)) if p < 1.0 else 0.0)

    out2 = pl.pallas_call(
        kernel,
        out_shape=jax.ShapeDtypeStruct((B, F), x.dtype),
        grid=(B // TB, F // TL),
        in_specs=[
            pl.BlockSpec((TB, TL), lambda i, j: (i, j)),     # x
            pl.BlockSpec((TB, TL), lambda i, j: (i, 0)),     # pe pattern (reused over j)
            pl.BlockSpec((TB, TL), lambda i, j: (i, j)),     # dropout uniforms
        ],
        out_specs=pl.BlockSpec((TB, TL), lambda i, j: (i, j)),
        compiler_params=pltpu.CompilerParams(
            # Independent elementwise blocks: "parallel" lets v7x shard the grid
            # over both TensorCores ("arbitrary" would leave one idle).
            dimension_semantics=("parallel", "parallel"),
        ),
    )(x2, pe_pattern, u2)
    return out2.reshape(B, S, D)


def positional_encoding(x, pe, *, dropout_rate: float, training: bool, key=None):
    """Forward pass of the reference module.

    x: (B, S, D) float32; pe: (max_len, 1, D) from build_pe. Returns (B, S, D)."""
    B, S, D = x.shape
    pe_slice = pe[:B]                         # reference slices pe by *batch* size
    if (not training) or dropout_rate <= 0.0:
        # Eval / p == 0: nn.Dropout is the identity. XLA fuses this broadcast-add
        # perfectly; the custom-call boundary + grid overhead would be pure loss.
        return x + pe_slice
    if key is None:
        key = jax.random.PRNGKey(0)
    # Keep/drop uniforms generated here (portable) and streamed into the kernel.
    # TODO(synk): on a TPU-only deployment, use the on-chip PRNG inside the kernel
    # (pltpu.prng_seed keyed by program_id + pltpu.prng_random_bits with an integer
    # threshold compare) to avoid this extra HBM read; it does not lower in the
    # CPU/interpret harness used to validate this script.
    u = jax.random.uniform(key, x.shape, jnp.float32)
    return _fused_add_dropout(x, pe_slice, u, float(dropout_rate))


if __name__ == "__main__":
    B, S, D, MAX_LEN = 2, 8, 2, 16
    DROPOUT = 0.1

    root = jax.random.PRNGKey(0)
    k_x, k_drop = jax.random.split(root)
    x = jax.random.normal(k_x, (B, S, D), dtype=jnp.float32)
    pe = build_pe(MAX_LEN, D)
    ref = np.asarray(x + pe[:B])

    # 1) Kernel add path (dropout branch statically disabled): must match exactly.
    out_add = jax.block_until_ready(
        _fused_add_dropout(x, pe[:B], jnp.zeros_like(x), 0.0))
    np.testing.assert_allclose(np.asarray(out_add), ref, rtol=1e-6, atol=1e-6)

    # 2) Eval mode (wrapper fast path, no Pallas call): identity dropout.
    out_eval = jax.block_until_ready(
        positional_encoding(x, pe, dropout_rate=DROPOUT, training=False))
    np.testing.assert_allclose(np.asarray(out_eval), ref, rtol=1e-6, atol=1e-6)

    # 3) Train mode through the kernel: each element is either dropped (0) or the
    #    reference value scaled by 1/(1-p).
    out_train = jax.block_until_ready(
        positional_encoding(x, pe, dropout_rate=DROPOUT, training=True, key=k_drop))
    scaled = ref / (1.0 - DROPOUT)
    ot = np.asarray(out_train)
    ok = np.isclose(ot, 0.0, atol=1e-6) | np.isclose(ot, scaled, rtol=1e-5, atol=1e-6)
    assert ok.all(), "train-mode dropout produced unexpected values"

    print("KERNEL_OK")
</pallas_src>

<mosaic_0001>
module attributes {stable_mosaic.version = 11 : i64} {
  func.func @_add_dropout_kernel(%arg0: i32, %arg1: i32, %arg2: memref<2x16xf32, #tpu.memory_space<vmem>>, %arg3: memref<2x16xf32, #tpu.memory_space<vmem>>, %arg4: memref<2x16xf32, #tpu.memory_space<vmem>>, %arg5: memref<2x16xf32, #tpu.memory_space<vmem>>) attributes {dimension_semantics = [#tpu.dimension_semantics<parallel>, #tpu.dimension_semantics<parallel>], iteration_bounds = array<i64: 1, 1>, scalar_prefetch = 0 : i64, scratch_operands = 0 : i64, tpu.core_type = #tpu.core_type<tc>, window_params = [{transform_indices = @transform_0, window_bounds = array<i64: 2, 16>}, {transform_indices = @transform_1, window_bounds = array<i64: 2, 16>}, {transform_indices = @transform_2, window_bounds = array<i64: 2, 16>}, {transform_indices = @transform_3, window_bounds = array<i64: 2, 16>}]} {
    %c0 = arith.constant 0 : index
    %c0_0 = arith.constant 0 : index
    %0 = vector.load %arg2[%c0, %c0_0] : memref<2x16xf32, #tpu.memory_space<vmem>>, vector<2x16xf32>
    %c0_1 = arith.constant 0 : index
    %c0_2 = arith.constant 0 : index
    %1 = vector.load %arg3[%c0_1, %c0_2] : memref<2x16xf32, #tpu.memory_space<vmem>>, vector<2x16xf32>
    %2 = arith.addf %0, %1 : vector<2x16xf32>
    %c0_3 = arith.constant 0 : index
    %c0_4 = arith.constant 0 : index
    %3 = vector.load %arg5[%c0_3, %c0_4] : memref<2x16xf32, #tpu.memory_space<vmem>>, vector<2x16xf32>
    tpu.vector_store %arg5[%c0_3, %c0_4], %2 {strides = array<i32>} : memref<2x16xf32, #tpu.memory_space<vmem>>, vector<2x16xf32>,
    return
  }
  func.func @transform_0(%arg0: i32, %arg1: i32) -> (i32, i32) {
    %c0_i32 = arith.constant 0 : i32
    return %arg0, %arg1 : i32, i32
  }
  func.func @transform_1(%arg0: i32, %arg1: i32) -> (i32, i32) {
    %c0_i32 = arith.constant 0 : i32
    %c0_i32_0 = arith.constant 0 : i32
    return %arg0, %c0_i32 : i32, i32
  }
  func.func @transform_2(%arg0: i32, %arg1: i32) -> (i32, i32) {
    %c0_i32 = arith.constant 0 : i32
    return %arg0, %arg1 : i32, i32
  }
  func.func @transform_3(%arg0: i32, %arg1: i32) -> (i32, i32) {
    %c0_i32 = arith.constant 0 : i32
    return %arg0, %arg1 : i32, i32
  }
}

</mosaic_0001>

<bundles_post_ra>
// kernel: tpu_custom_call.1
= control target key start
LH: loop header
LB: loop body
LE: loop exit
PB: predicated region body
PF: predicated region fallthrough
CT: control target
= control target key end

     0   :  { %8 = vsyncpa [#allocation3], 0  ;;  %s146_s0 = inlined_call_operand.hbm [shape: f32[2,16], index: 0, kind: input, shape index: {}]   ;;  %s147_s1 = inlined_call_operand.vmem [shape: f32[2,16], index: 1, kind: input, shape index: {}]   ;;  %s148_s2 = inlined_call_operand.vmem [shape: f32[2,16], index: 2, kind: input, shape index: {}]   ;;  %s149_s3 = inlined_call_operand.hbm [shape: f32[2,16], index: 3, kind: output, shape index: {}]  }
   0x1   :  { %9 = vsyncpa [#allocation4], 0  ;;  %s97_s12 = smov [#allocation2]   ;;  %s49_s16 = scalar_lea.hbm %s146_s0, 32 }
   0x2   :  { %s16_s13 = sshll.u32 %s97_s12, 4  ;;  %p50_p0 = scmp.ne.s32.totalorder %s146_s0, %s49_s16  ;;  %s17_s13 = int_to_ptr.vmem [resolvable:$true] %s16_s13 }
   0x3   :  { %p53_p1 = scmp.lt.u32.totalorder %s49_s16, %s146_s0 }
   0x5   :  { %p55_p2 = pnand %p53_p1, %p50_p0 }
   0x7   :  { %58 = shalt.err (!%p55_p2)
}
   0x8   :  { %s59_s2 = scalar_lea.vmem %s17_s13, 32  ;;  %p64_p4 = scmp.lt.s32.totalorder %s17_s13, %s17_s13 }
   0x9   :  { %p60_p3 = scmp.ne.s32.totalorder %s17_s13, %s59_s2  ;;  %p65_p5 = scmp.lt.s32.totalorder %s59_s2, %s59_s2 }
   0xb   :  { %p66_p6 = por %p65_p5, %p64_p4 }
   0xd   :  { %p67_p7 = pnand %p66_p6, %p60_p3 }
   0xf   :  { %70 = shalt.err (!%p67_p7)
}
  0x10   :  { %19 = dma.hbm_to_vmem [thread:$0]  %s146_s0, 32, %s17_s13, [#allocation3]  }
  0x11   :  { %93 = dma.done.wait [#allocation3], 32  }
  0x12   :  { %94 = vsyncadd [#allocation3], 4294967264  ;;  %s98_s23 = smov [#allocation5]   ;;  %v27_v0 = vld [vmem:[#allocation2] sm:$0x3]  ;;  %vm30_vm0 = vcmask 123904  }
  0x13   :  { %s38_s24 = sshll.u32 %s98_s23, 4  ;;  %v28_v1 = vld [vmem:[%s147_s1] sm:$0x3]  ;;  %s39_s24 = int_to_ptr.vmem [resolvable:$true] %s38_s24 }
  0x14   :  { %v29_v2 = vadd.f32 %v28_v1, %v27_v0  ;;  %s71_s27 = scalar_lea.vmem %s39_s24, 32  ;;  %p76_p9 = scmp.lt.s32.totalorder %s39_s24, %s39_s24 }
  0x15   :  { %p72_p8 = scmp.ne.s32.totalorder %s39_s24, %s71_s27  ;;  %p77_p10 = scmp.lt.s32.totalorder %s71_s27, %s71_s27 }
  0x16   :  { %31 = vst.msk [vmem:[#allocation5] sm:$0x3] %vm30_vm0, %v29_v2 }
  0x17   :  { %p78_p11 = por %p77_p10, %p76_p9 }
  0x19   :  { %p79_p12 = pnand %p78_p11, %p72_p8 }
  0x1b   :  { %82 = shalt.err (!%p79_p12)
}
  0x1c   :  { %s83_s29 = scalar_lea.hbm %s149_s3, 32 }
  0x1d   :  { %p84_p13 = scmp.ne.s32.totalorder %s149_s3, %s83_s29  ;;  %p87_p0 = scmp.lt.u32.totalorder %s83_s29, %s149_s3 }
  0x1f   :  { %p89_p1 = pnand %p87_p0, %p84_p13 }
  0x21   :  { %92 = shalt.err (!%p89_p1)
}
  0x22   :  { %41 = dma.vmem_to_hbm [thread:$0]  %s39_s24, 32, %s149_s3, [#allocation4]  }
  0x23   :  { %95 = dma.done.wait [#allocation4], 32  }
  0x24   :  { %96 = vsyncadd [#allocation4], 4294967264 }
  0x25   :  { %45 = vsyncpa [#allocation3], 1 }
  0x26   :  { %46 = vsyncpa [#allocation4], 1 }

</bundles_post_ra>
